<compile_context>
chip_gen: v7x
topology: tpu7x:2x2x1
jax: 0.10.0
libtpu: 0.0.40
codegen_flags: <defaults>
</compile_context>

<pallas_src>
import functools

import numpy as np
import jax
import jax.numpy as jnp
from jax import lax
from jax.experimental import pallas as pl
from jax.experimental.pallas import tpu as pltpu

EPS = 1e-5


# ----------------------------------------------------------------------------
# Pallas kernel: one batch element per grid step; 4 conv branches + fused
# conv_out_1 / conv_out_2, pool contribution added as a precomputed row.
# ----------------------------------------------------------------------------
def _aspp_kernel(x_ref,                                   # (H, W*Cin)        bf16
                 pool_ref,                                # (1, W*Cout)       f32  pool branch @ wout[4]
                 wb0_ref, wb1_ref, wb2_ref, wb3_ref,      # (nky_b*W*Cin, W*Cout) bf16 (BN scale folded)
                 bb0_ref, bb1_ref, bb2_ref, bb3_ref,      # (1, W*Cout)       f32  folded BN bias (tiled)
                 wout_ref,                                # (4*W*Cout, W*Cout) bf16 conv_out_1 (blockdiag)
                 so_ref, bo_ref,                          # (1, W*Cout)       f32  conv_out_2 BN scale/bias
                 out1_ref, out2_ref,                      # (H, W*Cout)       f32
                 xpad_ref,                                # (H+2*rh, W*Cin)   bf16 row-halo scratch
                 *, H, W, Cin, rh, branch_dys):
    dot = functools.partial(jnp.dot, preferred_element_type=jnp.float32)
    WC = W * Cin

    xin = x_ref[...]                                      # (H, W*Cin) bf16

    # Row-only halo (kx shifts live in the weights).  Zero only the top/bottom
    # frame every step -- the interior is fully rewritten, and there is no
    # program_id guard so this stays correct when the batch axis is split
    # across TensorCores ('parallel' semantics, scratch is per-core).
    if rh > 0:
        frame = jnp.zeros((rh, WC), dtype=xpad_ref.dtype)
        xpad_ref[0:rh, :] = frame
        xpad_ref[rh + H:rh + H + rh, :] = frame
        xpad_ref[rh:rh + H, :] = xin

    def slab(dy):
        # rows y of the slab hold x[y + dy, :] (zeros where out of range)
        return xin if dy == 0 else xpad_ref[rh + dy:rh + dy + H, :]

    # ---- branches 0-3: (<=3) matmuls per branch, kx taps folded in weights --
    acts = []
    for w_ref, b_ref, dys in zip((wb0_ref, wb1_ref, wb2_ref, wb3_ref),
                                 (bb0_ref, bb1_ref, bb2_ref, bb3_ref),
                                 branch_dys):
        pre = None
        for k, dy in enumerate(dys):
            # (H, W*Cin) @ (W*Cin, W*Cout) -> (H, W*Cout) f32 ; aligned sublane
            # slice of the stacked per-row-shift weight.
            part = dot(slab(dy), w_ref[k * WC:(k + 1) * WC, :])
            pre = part if pre is None else pre + part
        # Folded BN bias + ReLU.  Deliberate bf16 re-quantization of the branch
        # activation before the fused conv_out_1 matmul (MXU input dtype).
        acts.append(jnp.maximum(pre + b_ref[...], 0.0).astype(jnp.bfloat16))

    # ---- conv_out_1: single matmul over the lane-concat of the 4 branches ---
    # (128-lane-aligned concat) + precomputed pool-branch column, all in f32.
    cat = jnp.concatenate(acts, axis=-1)                  # (H, 4*W*Cout) bf16
    out1 = dot(cat, wout_ref[...]) + pool_ref[...]        # (H, W*Cout)   f32
    out1_ref[...] = out1

    # ---- conv_out_2: BN + ReLU on out_1 -------------------------------------
    out2_ref[...] = jnp.maximum(out1 * so_ref[...] + bo_ref[...], 0.0)


# ----------------------------------------------------------------------------
# Wrapper-side weight builders (trace-time; all "im2col" structure lives here)
# ----------------------------------------------------------------------------
def _dilated_branch(w_hwio, scale, rate, H, W):
    """One 3x3 atrous branch -> (row shifts, stacked lane-dense weight).

    Returns:
      dys   : tuple of surviving row shifts dy = (ky-1)*rate with |dy| < H.
      wbig  : (len(dys)*W*Cin, W*Cout) f32.  For each surviving ky, a
              (W*Cin, W*Cout) block whose entries place every surviving kx tap
              at the correct x position; out-of-image x positions are simply
              omitted (exact zero padding), so no lane halo is needed.
    """
    w = w_hwio * scale                                    # (3, 3, Cin, Cout)
    dys, blocks = [], []
    for ky in range(3):
        dy = (ky - 1) * rate
        if abs(dy) >= H:
            continue                                      # rows entirely in padding
        Cin, Cout = w.shape[2], w.shape[3]
        wky = jnp.zeros((W * Cin, W * Cout), jnp.float32)
        for kx in range(3):
            dx = (kx - 1) * rate
            if abs(dx) >= W:
                continue                                  # cols entirely in padding
            sel = np.zeros((W, W), np.float32)            # sel[p, x]=1 if out-pixel x reads col p
            for xx in range(W):
                p = xx + dx
                if 0 <= p < W:
                    sel[p, xx] = 1.0
            wky = wky + jnp.kron(jnp.asarray(sel), w[ky, kx])
        dys.append(dy)
        blocks.append(wky)
    return tuple(dys), jnp.concatenate(blocks, axis=0)


# ----------------------------------------------------------------------------
# Wrapper: NCHW in / NCHW out; BN folding, kron weight construction, pool
# branch hoist and bf16 casting done as glue in JAX.
# ----------------------------------------------------------------------------
def aspp_pallas(x_nchw, P, rates=(6, 12, 18)):
    assert len(rates) == 3, "module uses exactly three atrous rates"
    x = jnp.transpose(x_nchw, (0, 2, 3, 1)).astype(jnp.float32)     # NHWC
    N, H, W, Cin = x.shape
    Cout = P['w0'].shape[-1]
    nb = len(rates) + 2                                              # 5 branches
    bf16 = jnp.bfloat16
    eyeW = jnp.eye(W, dtype=jnp.float32)
    hi = lax.Precision.HIGHEST

    def fold_bn(bnp):
        g, b, m, v = bnp
        s = g / jnp.sqrt(v + EPS)
        return s, b - m * s

    def row(v):                     # (Cout,) -> (1, W*Cout), x-major / channel-minor
        return jnp.tile(v.astype(jnp.float32), W).reshape(1, W * Cout)

    s0, b0 = fold_bn(P['bn0'])
    sp, bp = fold_bn(P['bnp'])
    so, bo = fold_bn(P['bno'])

    # ---- branch 0 (1x1 conv): block-diagonal lane-dense weight --------------
    branch_ws = [jnp.kron(eyeW, P['w0'] * s0).astype(bf16)]          # (W*Cin, W*Cout)
    branch_bs = [row(b0)]
    branch_dys = [(0,)]

    # ---- branches 1-3 (3x3 atrous convs) ------------------------------------
    for wk, bnk, r in zip(('w1', 'w2', 'w3'), ('bn1', 'bn2', 'bn3'), rates):
        s, b = fold_bn(P[bnk])
        dys, wbig = _dilated_branch(P[wk], s, r, H, W)
        branch_dys.append(dys)
        branch_ws.append(wbig.astype(bf16))
        branch_bs.append(row(b))

    # ---- conv_out_1 over the 4 conv branches (block-diag per branch) --------
    wout = P['wout']                                                 # (5*Cout, Cout)
    wout_big = jnp.concatenate(
        [jnp.kron(eyeW, wout[i * Cout:(i + 1) * Cout, :]) for i in range(nb - 1)],
        axis=0).astype(bf16)                                         # (4*W*Cout, W*Cout)

    # ---- pool branch hoisted: per-image (1, W*Cout) contribution to out_1 ---
    # global mean -> 1x1 conv + BN + ReLU -> conv_out_1 column (bilinear
    # upsample of a 1x1 map is an exact constant broadcast).
    xm = jnp.mean(x, axis=(1, 2))                                    # (N, Cin)
    pooled = jnp.maximum(jnp.dot(xm, P['wp'] * sp, precision=hi) + bp, 0.0)
    pool_contrib = jnp.dot(pooled, wout[(nb - 1) * Cout:, :], precision=hi)   # (N, Cout)
    pool_row = jnp.tile(pool_contrib, (1, W)).reshape(N, 1, W * Cout).astype(jnp.float32)

    so_row, bo_row = row(so), row(bo)

    # halo = max surviving row shift (rate 18 statically reduces to its center
    # tap at H=16, so rh = 12, not 18)
    rh = max((abs(d) for dys in branch_dys for d in dys), default=0)

    x_flat = x.reshape(N, H, W * Cin).astype(bf16)                   # lane-dense input

    consts = tuple(branch_ws) + tuple(branch_bs) + (wout_big, so_row, bo_row)

    def const_spec(a):
        return pl.BlockSpec(a.shape, lambda n, nd=a.ndim: (0,) * nd)
        # TODO(synk): at production sizes single-buffer these constant-index
        # blocks with pipeline_mode=pl.Buffered(1) and set vmem_limit_bytes
        # explicitly for the v7x 64 MiB budget.

    x_spec = pl.BlockSpec((None, H, W * Cin), lambda n: (n, 0, 0))
    pool_spec = pl.BlockSpec((None, 1, W * Cout), lambda n: (n, 0, 0))
    out_spec = pl.BlockSpec((None, H, W * Cout), lambda n: (n, 0, 0))

    kernel = functools.partial(_aspp_kernel, H=H, W=W, Cin=Cin, rh=rh,
                               branch_dys=tuple(branch_dys))

    out1, out2 = pl.pallas_call(
        kernel,
        out_shape=(jax.ShapeDtypeStruct((N, H, W * Cout), jnp.float32),
                   jax.ShapeDtypeStruct((N, H, W * Cout), jnp.float32)),
        grid=(N,),
        in_specs=[x_spec, pool_spec] + [const_spec(a) for a in consts],
        out_specs=(out_spec, out_spec),
        scratch_shapes=[pltpu.VMEM((H + 2 * rh, W * Cin), bf16)],
        compiler_params=pltpu.CompilerParams(
            dimension_semantics=("parallel",)),
    )(x_flat, pool_row, *consts)

    # lane-dense slab -> NCHW (PyTorch convention)
    def to_nchw(o):
        return jnp.transpose(o.reshape(N, H, W, Cout), (0, 3, 1, 2))

    return to_nchw(out1), to_nchw(out2)


# ----------------------------------------------------------------------------
# Deterministic parameter init (synthetic; no checkpoint loading)
# ----------------------------------------------------------------------------
def init_params(key, cin, cout, rates):
    keys = iter(jax.random.split(key, 32))

    def w(shape, scale=0.2):
        return scale * jax.random.normal(next(keys), shape, jnp.float32)

    def bn(c):
        g = 0.5 + jax.random.uniform(next(keys), (c,), jnp.float32)
        b = 0.1 * jax.random.normal(next(keys), (c,), jnp.float32)
        m = 0.1 * jax.random.normal(next(keys), (c,), jnp.float32)
        v = 0.5 + jax.random.uniform(next(keys), (c,), jnp.float32)
        return (g, b, m, v)

    return dict(
        w0=w((cin, cout)),
        w1=w((3, 3, cin, cout)),        # HWIO
        w2=w((3, 3, cin, cout)),
        w3=w((3, 3, cin, cout)),
        wp=w((cin, cout)),
        wout=w(((len(rates) + 2) * cout, cout)),
        bn0=bn(cout), bn1=bn(cout), bn2=bn(cout),
        bn3=bn(cout), bnp=bn(cout), bno=bn(cout),
    )


# ----------------------------------------------------------------------------
# Pure-JAX reference (eval-mode BN, full f32) for verification
# ----------------------------------------------------------------------------
def aspp_reference(x_nhwc, P, rates):
    def conv(x, w_hwio, pad, dil):
        return lax.conv_general_dilated(
            x, w_hwio, window_strides=(1, 1),
            padding=[(pad, pad), (pad, pad)],
            rhs_dilation=(dil, dil),
            dimension_numbers=('NHWC', 'HWIO', 'NHWC'),
            precision=lax.Precision.HIGHEST)

    def bn_relu(y, bnp):
        g, b, m, v = bnp
        return jnp.maximum((y - m) / jnp.sqrt(v + EPS) * g + b, 0.0)

    br0 = bn_relu(conv(x_nhwc, P['w0'][None, None], 0, 1), P['bn0'])
    br1 = bn_relu(conv(x_nhwc, P['w1'], rates[0], rates[0]), P['bn1'])
    br2 = bn_relu(conv(x_nhwc, P['w2'], rates[1], rates[1]), P['bn2'])
    br3 = bn_relu(conv(x_nhwc, P['w3'], rates[2], rates[2]), P['bn3'])
    xm = jnp.mean(x_nhwc, axis=(1, 2), keepdims=True)
    brp = bn_relu(conv(xm, P['wp'][None, None], 0, 1), P['bnp'])
    brp = jnp.broadcast_to(brp, br0.shape)
    cat = jnp.concatenate([br0, br1, br2, br3, brp], axis=-1)
    out1 = conv(cat, P['wout'][None, None], 0, 1)
    g, b, m, v = P['bno']
    out2 = jnp.maximum((out1 - m) / jnp.sqrt(v + EPS) * g + b, 0.0)
    return out1, out2


if __name__ == "__main__":
    key = jax.random.PRNGKey(0)
    kx, kp = jax.random.split(key)

    N, Cin, H, W = 2, 4, 16, 16
    Cout = 8
    rates = (6, 12, 18)

    x_nchw = jax.random.normal(kx, (N, Cin, H, W), jnp.float32)
    P = init_params(kp, Cin, Cout, rates)

    out1, out2 = aspp_pallas(x_nchw, P, rates)
    jax.block_until_ready((out1, out2))

    # verify against the pure-JAX f32 reference
    x_nhwc = jnp.transpose(x_nchw, (0, 2, 3, 1))
    ref1, ref2 = aspp_reference(x_nhwc, P, rates)
    ref1 = jnp.transpose(ref1, (0, 3, 1, 2))
    ref2 = jnp.transpose(ref2, (0, 3, 1, 2))

    assert out1.shape == (N, Cout, H, W) and out2.shape == (N, Cout, H, W)
    # The kernel runs its MXU matmuls with bf16 inputs / f32 accumulation, so
    # compare against the full-f32 reference at bf16-level tolerance (a real
    # indexing/weight bug would produce errors orders of magnitude larger).
    assert jnp.allclose(out1, ref1, rtol=5e-2, atol=5e-2), "out_1 mismatch"
    assert jnp.allclose(out2, ref2, rtol=5e-2, atol=5e-2), "out_2 mismatch"

    print("KERNEL_OK")
</pallas_src>

<mosaic_0001>
module attributes {stable_mosaic.version = 11 : i64} {
  func.func @_aspp_kernel(%arg0: i32, %arg1: memref<1x16x64xbf16, #tpu.memory_space<vmem>>, %arg2: memref<1x1x128xf32, #tpu.memory_space<vmem>>, %arg3: memref<64x128xbf16, #tpu.memory_space<vmem>>, %arg4: memref<192x128xbf16, #tpu.memory_space<vmem>>, %arg5: memref<192x128xbf16, #tpu.memory_space<vmem>>, %arg6: memref<64x128xbf16, #tpu.memory_space<vmem>>, %arg7: memref<1x128xf32, #tpu.memory_space<vmem>>, %arg8: memref<1x128xf32, #tpu.memory_space<vmem>>, %arg9: memref<1x128xf32, #tpu.memory_space<vmem>>, %arg10: memref<1x128xf32, #tpu.memory_space<vmem>>, %arg11: memref<512x128xbf16, #tpu.memory_space<vmem>>, %arg12: memref<1x128xf32, #tpu.memory_space<vmem>>, %arg13: memref<1x128xf32, #tpu.memory_space<vmem>>, %arg14: memref<1x16x128xf32, #tpu.memory_space<vmem>>, %arg15: memref<1x16x128xf32, #tpu.memory_space<vmem>>, %arg16: memref<40x64xbf16, #tpu.memory_space<vmem>>) attributes {dimension_semantics = [#tpu.dimension_semantics<parallel>], iteration_bounds = array<i64: 2>, scalar_prefetch = 0 : i64, scratch_operands = 1 : i64, tpu.core_type = #tpu.core_type<tc>, window_params = [{transform_indices = @transform_0, window_bounds = array<i64: 1, 16, 64>}, {transform_indices = @transform_1, window_bounds = array<i64: 1, 1, 128>}, {pipeline_mode = #tpu.pipeline_mode<synchronous>, transform_indices = @transform_2, window_bounds = array<i64: 64, 128>}, {pipeline_mode = #tpu.pipeline_mode<synchronous>, transform_indices = @transform_3, window_bounds = array<i64: 192, 128>}, {pipeline_mode = #tpu.pipeline_mode<synchronous>, transform_indices = @transform_4, window_bounds = array<i64: 192, 128>}, {pipeline_mode = #tpu.pipeline_mode<synchronous>, transform_indices = @transform_5, window_bounds = array<i64: 64, 128>}, {pipeline_mode = #tpu.pipeline_mode<synchronous>, transform_indices = @transform_6, window_bounds = array<i64: 1, 128>}, {pipeline_mode = #tpu.pipeline_mode<synchronous>, transform_indices = @transform_7, window_bounds = array<i64: 1, 128>}, {pipeline_mode = #tpu.pipeline_mode<synchronous>, transform_indices = @transform_8, window_bounds = array<i64: 1, 128>}, {pipeline_mode = #tpu.pipeline_mode<synchronous>, transform_indices = @transform_9, window_bounds = array<i64: 1, 128>}, {pipeline_mode = #tpu.pipeline_mode<synchronous>, transform_indices = @transform_10, window_bounds = array<i64: 512, 128>}, {pipeline_mode = #tpu.pipeline_mode<synchronous>, transform_indices = @transform_11, window_bounds = array<i64: 1, 128>}, {pipeline_mode = #tpu.pipeline_mode<synchronous>, transform_indices = @transform_12, window_bounds = array<i64: 1, 128>}, {transform_indices = @transform_13, window_bounds = array<i64: 1, 16, 128>}, {transform_indices = @transform_14, window_bounds = array<i64: 1, 16, 128>}]} {
    %c0 = arith.constant 0 : index
    %c0_0 = arith.constant 0 : index
    %c0_1 = arith.constant 0 : index
    %0 = vector.load %arg1[%c0, %c0_0, %c0_1] : memref<1x16x64xbf16, #tpu.memory_space<vmem>>, vector<1x16x64xbf16>
    %1 = vector.shape_cast %0 : vector<1x16x64xbf16> to vector<16x64xbf16>
    %cst = arith.constant 0.000000e+00 : bf16
    %2 = vector.broadcast %cst : bf16 to vector<12x64xbf16>
    %c0_2 = arith.constant 0 : index
    %c0_3 = arith.constant 0 : index
    %3 = vector.load %arg16[%c0_2, %c0_3] : memref<40x64xbf16, #tpu.memory_space<vmem>>, vector<12x64xbf16>
    tpu.vector_store %arg16[%c0_2, %c0_3], %2 {strides = array<i32>} : memref<40x64xbf16, #tpu.memory_space<vmem>>, vector<12x64xbf16>,
    %c28 = arith.constant 28 : index
    %c0_4 = arith.constant 0 : index
    %4 = vector.load %arg16[%c28, %c0_4] : memref<40x64xbf16, #tpu.memory_space<vmem>>, vector<12x64xbf16>
    tpu.vector_store %arg16[%c28, %c0_4], %2 {strides = array<i32>} : memref<40x64xbf16, #tpu.memory_space<vmem>>, vector<12x64xbf16>,
    %c12 = arith.constant 12 : index
    %c0_5 = arith.constant 0 : index
    %5 = vector.load %arg16[%c12, %c0_5] : memref<40x64xbf16, #tpu.memory_space<vmem>>, vector<16x64xbf16>
    tpu.vector_store %arg16[%c12, %c0_5], %1 {strides = array<i32>} : memref<40x64xbf16, #tpu.memory_space<vmem>>, vector<16x64xbf16>,
    %c0_6 = arith.constant 0 : index
    %c0_7 = arith.constant 0 : index
    %6 = vector.load %arg3[%c0_6, %c0_7] : memref<64x128xbf16, #tpu.memory_space<vmem>>, vector<64x128xbf16>
    %cst_8 = arith.constant dense<0.000000e+00> : vector<16x128xf32>
    %7 = tpu.matmul %1, %6, %cst_8 {dimension_numbers = #tpu.dot_dimension_numbers<[1], [0], [0], [1], [0, 0, 1, 1], [], []>} : vector<16x64xbf16>, vector<64x128xbf16>, vector<16x128xf32> -> vector<16x128xf32>
    %c0_9 = arith.constant 0 : index
    %c0_10 = arith.constant 0 : index
    %8 = vector.load %arg7[%c0_9, %c0_10] : memref<1x128xf32, #tpu.memory_space<vmem>>, vector<1x128xf32>
    %9 = vector.broadcast %8 : vector<1x128xf32> to vector<16x128xf32>
    %10 = arith.addf %7, %9 : vector<16x128xf32>
    %cst_11 = arith.constant 0.000000e+00 : f32
    %11 = vector.broadcast %cst_11 : f32 to vector<16x128xf32>
    %12 = arith.maximumf %10, %11 : vector<16x128xf32>
    %13 = arith.truncf %12 : vector<16x128xf32> to vector<16x128xbf16>
    %c6 = arith.constant 6 : index
    %c0_12 = arith.constant 0 : index
    %14 = vector.load %arg16[%c6, %c0_12] : memref<40x64xbf16, #tpu.memory_space<vmem>>, vector<16x64xbf16>
    %c0_13 = arith.constant 0 : index
    %c0_14 = arith.constant 0 : index
    %15 = vector.load %arg4[%c0_13, %c0_14] : memref<192x128xbf16, #tpu.memory_space<vmem>>, vector<64x128xbf16>
    %cst_15 = arith.constant dense<0.000000e+00> : vector<16x128xf32>
    %16 = tpu.matmul %14, %15, %cst_15 {dimension_numbers = #tpu.dot_dimension_numbers<[1], [0], [0], [1], [0, 0, 1, 1], [], []>} : vector<16x64xbf16>, vector<64x128xbf16>, vector<16x128xf32> -> vector<16x128xf32>
    %c64 = arith.constant 64 : index
    %c0_16 = arith.constant 0 : index
    %17 = vector.load %arg4[%c64, %c0_16] : memref<192x128xbf16, #tpu.memory_space<vmem>>, vector<64x128xbf16>
    %cst_17 = arith.constant dense<0.000000e+00> : vector<16x128xf32>
    %18 = tpu.matmul %1, %17, %cst_17 {dimension_numbers = #tpu.dot_dimension_numbers<[1], [0], [0], [1], [0, 0, 1, 1], [], []>} : vector<16x64xbf16>, vector<64x128xbf16>, vector<16x128xf32> -> vector<16x128xf32>
    %19 = arith.addf %16, %18 : vector<16x128xf32>
    %c18 = arith.constant 18 : index
    %c0_18 = arith.constant 0 : index
    %20 = vector.load %arg16[%c18, %c0_18] : memref<40x64xbf16, #tpu.memory_space<vmem>>, vector<16x64xbf16>
    %c128 = arith.constant 128 : index
    %c0_19 = arith.constant 0 : index
    %21 = vector.load %arg4[%c128, %c0_19] : memref<192x128xbf16, #tpu.memory_space<vmem>>, vector<64x128xbf16>
    %cst_20 = arith.constant dense<0.000000e+00> : vector<16x128xf32>
    %22 = tpu.matmul %20, %21, %cst_20 {dimension_numbers = #tpu.dot_dimension_numbers<[1], [0], [0], [1], [0, 0, 1, 1], [], []>} : vector<16x64xbf16>, vector<64x128xbf16>, vector<16x128xf32> -> vector<16x128xf32>
    %23 = arith.addf %19, %22 : vector<16x128xf32>
    %c0_21 = arith.constant 0 : index
    %c0_22 = arith.constant 0 : index
    %24 = vector.load %arg8[%c0_21, %c0_22] : memref<1x128xf32, #tpu.memory_space<vmem>>, vector<1x128xf32>
    %25 = vector.broadcast %24 : vector<1x128xf32> to vector<16x128xf32>
    %26 = arith.addf %23, %25 : vector<16x128xf32>
    %cst_23 = arith.constant 0.000000e+00 : f32
    %27 = vector.broadcast %cst_23 : f32 to vector<16x128xf32>
    %28 = arith.maximumf %26, %27 : vector<16x128xf32>
    %29 = arith.truncf %28 : vector<16x128xf32> to vector<16x128xbf16>
    %c0_24 = arith.constant 0 : index
    %c0_25 = arith.constant 0 : index
    %30 = vector.load %arg16[%c0_24, %c0_25] : memref<40x64xbf16, #tpu.memory_space<vmem>>, vector<16x64xbf16>
    %c0_26 = arith.constant 0 : index
    %c0_27 = arith.constant 0 : index
    %31 = vector.load %arg5[%c0_26, %c0_27] : memref<192x128xbf16, #tpu.memory_space<vmem>>, vector<64x128xbf16>
    %cst_28 = arith.constant dense<0.000000e+00> : vector<16x128xf32>
    %32 = tpu.matmul %30, %31, %cst_28 {dimension_numbers = #tpu.dot_dimension_numbers<[1], [0], [0], [1], [0, 0, 1, 1], [], []>} : vector<16x64xbf16>, vector<64x128xbf16>, vector<16x128xf32> -> vector<16x128xf32>
    %c64_29 = arith.constant 64 : index
    %c0_30 = arith.constant 0 : index
    %33 = vector.load %arg5[%c64_29, %c0_30] : memref<192x128xbf16, #tpu.memory_space<vmem>>, vector<64x128xbf16>
    %cst_31 = arith.constant dense<0.000000e+00> : vector<16x128xf32>
    %34 = tpu.matmul %1, %33, %cst_31 {dimension_numbers = #tpu.dot_dimension_numbers<[1], [0], [0], [1], [0, 0, 1, 1], [], []>} : vector<16x64xbf16>, vector<64x128xbf16>, vector<16x128xf32> -> vector<16x128xf32>
    %35 = arith.addf %32, %34 : vector<16x128xf32>
    %c24 = arith.constant 24 : index
    %c0_32 = arith.constant 0 : index
    %36 = vector.load %arg16[%c24, %c0_32] : memref<40x64xbf16, #tpu.memory_space<vmem>>, vector<16x64xbf16>
    %c128_33 = arith.constant 128 : index
    %c0_34 = arith.constant 0 : index
    %37 = vector.load %arg5[%c128_33, %c0_34] : memref<192x128xbf16, #tpu.memory_space<vmem>>, vector<64x128xbf16>
    %cst_35 = arith.constant dense<0.000000e+00> : vector<16x128xf32>
    %38 = tpu.matmul %36, %37, %cst_35 {dimension_numbers = #tpu.dot_dimension_numbers<[1], [0], [0], [1], [0, 0, 1, 1], [], []>} : vector<16x64xbf16>, vector<64x128xbf16>, vector<16x128xf32> -> vector<16x128xf32>
    %39 = arith.addf %35, %38 : vector<16x128xf32>
    %c0_36 = arith.constant 0 : index
    %c0_37 = arith.constant 0 : index
    %40 = vector.load %arg9[%c0_36, %c0_37] : memref<1x128xf32, #tpu.memory_space<vmem>>, vector<1x128xf32>
    %41 = vector.broadcast %40 : vector<1x128xf32> to vector<16x128xf32>
    %42 = arith.addf %39, %41 : vector<16x128xf32>
    %cst_38 = arith.constant 0.000000e+00 : f32
    %43 = vector.broadcast %cst_38 : f32 to vector<16x128xf32>
    %44 = arith.maximumf %42, %43 : vector<16x128xf32>
    %45 = arith.truncf %44 : vector<16x128xf32> to vector<16x128xbf16>
    %c0_39 = arith.constant 0 : index
    %c0_40 = arith.constant 0 : index
    %46 = vector.load %arg6[%c0_39, %c0_40] : memref<64x128xbf16, #tpu.memory_space<vmem>>, vector<64x128xbf16>
    %cst_41 = arith.constant dense<0.000000e+00> : vector<16x128xf32>
    %47 = tpu.matmul %1, %46, %cst_41 {dimension_numbers = #tpu.dot_dimension_numbers<[1], [0], [0], [1], [0, 0, 1, 1], [], []>} : vector<16x64xbf16>, vector<64x128xbf16>, vector<16x128xf32> -> vector<16x128xf32>
    %c0_42 = arith.constant 0 : index
    %c0_43 = arith.constant 0 : index
    %48 = vector.load %arg10[%c0_42, %c0_43] : memref<1x128xf32, #tpu.memory_space<vmem>>, vector<1x128xf32>
    %49 = vector.broadcast %48 : vector<1x128xf32> to vector<16x128xf32>
    %50 = arith.addf %47, %49 : vector<16x128xf32>
    %cst_44 = arith.constant 0.000000e+00 : f32
    %51 = vector.broadcast %cst_44 : f32 to vector<16x128xf32>
    %52 = arith.maximumf %50, %51 : vector<16x128xf32>
    %53 = arith.truncf %52 : vector<16x128xf32> to vector<16x128xbf16>
    %54 = tpu.concatenate %13, %29, %45, %53 in 1 : vector<16x128xbf16>, vector<16x128xbf16>, vector<16x128xbf16>, vector<16x128xbf16> -> vector<16x512xbf16>
    %c0_45 = arith.constant 0 : index
    %c0_46 = arith.constant 0 : index
    %55 = vector.load %arg11[%c0_45, %c0_46] : memref<512x128xbf16, #tpu.memory_space<vmem>>, vector<512x128xbf16>
    %cst_47 = arith.constant dense<0.000000e+00> : vector<16x128xf32>
    %56 = tpu.matmul %54, %55, %cst_47 {dimension_numbers = #tpu.dot_dimension_numbers<[1], [0], [0], [1], [0, 0, 1, 1], [], []>} : vector<16x512xbf16>, vector<512x128xbf16>, vector<16x128xf32> -> vector<16x128xf32>
    %c0_48 = arith.constant 0 : index
    %c0_49 = arith.constant 0 : index
    %c0_50 = arith.constant 0 : index
    %57 = vector.load %arg2[%c0_48, %c0_49, %c0_50] : memref<1x1x128xf32, #tpu.memory_space<vmem>>, vector<1x1x128xf32>
    %58 = vector.shape_cast %57 : vector<1x1x128xf32> to vector<1x128xf32>
    %59 = vector.broadcast %58 : vector<1x128xf32> to vector<16x128xf32>
    %60 = arith.addf %56, %59 : vector<16x128xf32>
    %c0_51 = arith.constant 0 : index
    %c0_52 = arith.constant 0 : index
    %c0_53 = arith.constant 0 : index
    %61 = vector.load %arg14[%c0_51, %c0_52, %c0_53] : memref<1x16x128xf32, #tpu.memory_space<vmem>>, vector<1x16x128xf32>
    %62 = vector.shape_cast %61 : vector<1x16x128xf32> to vector<16x128xf32>
    %63 = vector.shape_cast %60 : vector<16x128xf32> to vector<1x16x128xf32>
    tpu.vector_store %arg14[%c0_51, %c0_52, %c0_53], %63 {strides = array<i32>} : memref<1x16x128xf32, #tpu.memory_space<vmem>>, vector<1x16x128xf32>,
    %c0_54 = arith.constant 0 : index
    %c0_55 = arith.constant 0 : index
    %64 = vector.load %arg12[%c0_54, %c0_55] : memref<1x128xf32, #tpu.memory_space<vmem>>, vector<1x128xf32>
    %65 = vector.broadcast %64 : vector<1x128xf32> to vector<16x128xf32>
    %66 = arith.mulf %60, %65 : vector<16x128xf32>
    %c0_56 = arith.constant 0 : index
    %c0_57 = arith.constant 0 : index
    %67 = vector.load %arg13[%c0_56, %c0_57] : memref<1x128xf32, #tpu.memory_space<vmem>>, vector<1x128xf32>
    %68 = vector.broadcast %67 : vector<1x128xf32> to vector<16x128xf32>
    %69 = arith.addf %66, %68 : vector<16x128xf32>
    %cst_58 = arith.constant 0.000000e+00 : f32
    %70 = vector.broadcast %cst_58 : f32 to vector<16x128xf32>
    %71 = arith.maximumf %69, %70 : vector<16x128xf32>
    %c0_59 = arith.constant 0 : index
    %c0_60 = arith.constant 0 : index
    %c0_61 = arith.constant 0 : index
    %72 = vector.load %arg15[%c0_59, %c0_60, %c0_61] : memref<1x16x128xf32, #tpu.memory_space<vmem>>, vector<1x16x128xf32>
    %73 = vector.shape_cast %72 : vector<1x16x128xf32> to vector<16x128xf32>
    %74 = vector.shape_cast %71 : vector<16x128xf32> to vector<1x16x128xf32>
    tpu.vector_store %arg15[%c0_59, %c0_60, %c0_61], %74 {strides = array<i32>} : memref<1x16x128xf32, #tpu.memory_space<vmem>>, vector<1x16x128xf32>,
    return
  }
  func.func @transform_0(%arg0: i32) -> (i32, i32, i32) {
    %c0_i32 = arith.constant 0 : i32
    %c0_i32_0 = arith.constant 0 : i32
    %c0_i32_1 = arith.constant 0 : i32
    return %arg0, %c0_i32, %c0_i32_0 : i32, i32, i32
  }
  func.func @transform_1(%arg0: i32) -> (i32, i32, i32) {
    %c0_i32 = arith.constant 0 : i32
    %c0_i32_0 = arith.constant 0 : i32
    %c0_i32_1 = arith.constant 0 : i32
    return %arg0, %c0_i32, %c0_i32_0 : i32, i32, i32
  }
  func.func @transform_2(%arg0: i32) -> (i32, i32) {
    %c0_i32 = arith.constant 0 : i32
    %c0_i32_0 = arith.constant 0 : i32
    %c0_i32_1 = arith.constant 0 : i32
    return %c0_i32, %c0_i32_0 : i32, i32
  }
  func.func @transform_3(%arg0: i32) -> (i32, i32) {
    %c0_i32 = arith.constant 0 : i32
    %c0_i32_0 = arith.constant 0 : i32
    %c0_i32_1 = arith.constant 0 : i32
    return %c0_i32, %c0_i32_0 : i32, i32
  }
  func.func @transform_4(%arg0: i32) -> (i32, i32) {
    %c0_i32 = arith.constant 0 : i32
    %c0_i32_0 = arith.constant 0 : i32
    %c0_i32_1 = arith.constant 0 : i32
    return %c0_i32, %c0_i32_0 : i32, i32
  }
  func.func @transform_5(%arg0: i32) -> (i32, i32) {
    %c0_i32 = arith.constant 0 : i32
    %c0_i32_0 = arith.constant 0 : i32
    %c0_i32_1 = arith.constant 0 : i32
    return %c0_i32, %c0_i32_0 : i32, i32
  }
  func.func @transform_6(%arg0: i32) -> (i32, i32) {
    %c0_i32 = arith.constant 0 : i32
    %c0_i32_0 = arith.constant 0 : i32
    %c0_i32_1 = arith.constant 0 : i32
    return %c0_i32, %c0_i32_0 : i32, i32
  }
  func.func @transform_7(%arg0: i32) -> (i32, i32) {
    %c0_i32 = arith.constant 0 : i32
    %c0_i32_0 = arith.constant 0 : i32
    %c0_i32_1 = arith.constant 0 : i32
    return %c0_i32, %c0_i32_0 : i32, i32
  }
  func.func @transform_8(%arg0: i32) -> (i32, i32) {
    %c0_i32 = arith.constant 0 : i32
    %c0_i32_0 = arith.constant 0 : i32
    %c0_i32_1 = arith.constant 0 : i32
    return %c0_i32, %c0_i32_0 : i32, i32
  }
  func.func @transform_9(%arg0: i32) -> (i32, i32) {
    %c0_i32 = arith.constant 0 : i32
    %c0_i32_0 = arith.constant 0 : i32
    %c0_i32_1 = arith.constant 0 : i32
    return %c0_i32, %c0_i32_0 : i32, i32
  }
  func.func @transform_10(%arg0: i32) -> (i32, i32) {
    %c0_i32 = arith.constant 0 : i32
    %c0_i32_0 = arith.constant 0 : i32
    %c0_i32_1 = arith.constant 0 : i32
    return %c0_i32, %c0_i32_0 : i32, i32
  }
  func.func @transform_11(%arg0: i32) -> (i32, i32) {
    %c0_i32 = arith.constant 0 : i32
    %c0_i32_0 = arith.constant 0 : i32
    %c0_i32_1 = arith.constant 0 : i32
    return %c0_i32, %c0_i32_0 : i32, i32
  }
  func.func @transform_12(%arg0: i32) -> (i32, i32) {
    %c0_i32 = arith.constant 0 : i32
    %c0_i32_0 = arith.constant 0 : i32
    %c0_i32_1 = arith.constant 0 : i32
    return %c0_i32, %c0_i32_0 : i32, i32
  }
  func.func @transform_13(%arg0: i32) -> (i32, i32, i32) {
    %c0_i32 = arith.constant 0 : i32
    %c0_i32_0 = arith.constant 0 : i32
    %c0_i32_1 = arith.constant 0 : i32
    return %arg0, %c0_i32, %c0_i32_0 : i32, i32, i32
  }
  func.func @transform_14(%arg0: i32) -> (i32, i32, i32) {
    %c0_i32 = arith.constant 0 : i32
    %c0_i32_0 = arith.constant 0 : i32
    %c0_i32_1 = arith.constant 0 : i32
    return %arg0, %c0_i32, %c0_i32_0 : i32, i32, i32
  }
}

</mosaic_0001>

<bundles_post_ra>
// kernel: tpu_custom_call.1
= control target key start
LH: loop header
LB: loop body
LE: loop exit
PB: predicated region body
PF: predicated region fallthrough
CT: control target
= control target key end

     0   :  { %s3184_s0 = inlined_call_operand.hbm [shape: bf16[2,16,64], index: 0, kind: input, shape index: {}]   ;;  %s3185_s1 = inlined_call_operand.vmem [shape: f32[2,1,128], index: 1, kind: input, shape index: {}]   ;;  %s3186_s2 = inlined_call_operand.hbm [shape: bf16[64,128], index: 2, kind: input, shape index: {}]   ;;  %s3187_s3 = inlined_call_operand.hbm [shape: bf16[192,128], index: 3, kind: input, shape index: {}]   ;;  %s3188_s4 = inlined_call_operand.hbm [shape: bf16[192,128], index: 4, kind: input, shape index: {}]   ;;  %s3189_s5 = inlined_call_operand.hbm [shape: bf16[64,128], index: 5, kind: input, shape index: {}]   ;;  %s3190_s6 = inlined_call_operand.vmem [shape: f32[1,128], index: 6, kind: input, shape index: {}]   ;;  %s3191_s7 = inlined_call_operand.vmem [shape: f32[1,128], index: 7, kind: input, shape index: {}]   ;;  %s3192_s8 = inlined_call_operand.vmem [shape: f32[1,128], index: 8, kind: input, shape index: {}]   ;;  %s3193_s9 = inlined_call_operand.vmem [shape: f32[1,128], index: 9, kind: input, shape index: {}]   ;;  %s3194_s10 = inlined_call_operand.hbm [shape: bf16[512,128], index: 10, kind: input, shape index: {}]   ;;  %s3195_s11 = inlined_call_operand.vmem [shape: f32[1,128], index: 11, kind: input, shape index: {}]   ;;  %s3196_s12 = inlined_call_operand.vmem [shape: f32[1,128], index: 12, kind: input, shape index: {}]   ;;  %s3197_s13 = inlined_call_operand.hbm [shape: f32[2,16,128], index: 13, kind: output, shape index: {0}]   ;;  %s3198_s14 = inlined_call_operand.hbm [shape: f32[2,16,128], index: 14, kind: output, shape index: {1}]  }
   0x1   :  { %3206 = sst [smem:[#allocation23_spill]] %s3184_s0 }
   0x2   :  { %3207 = sst [smem:[#allocation24_spill]] %s3185_s1 }
   0x3   :  { %3208 = sst [smem:[#allocation25_spill]] %s3186_s2 }
   0x4   :  { %3209 = sst [smem:[#allocation26_spill]] %s3187_s3 }
   0x5   :  { %3210 = sst [smem:[#allocation27_spill]] %s3192_s8 }
   0x6   :  { %3211 = sst [smem:[#allocation28_spill]] %s3195_s11 }
   0x7   :  { %3212 = sst [smem:[#allocation29_spill]] %s3196_s12 }
   0x8   :  { %3213 = sst [smem:[#allocation30_spill]] %s3197_s13 }
   0x9   :  { %3214 = sst [smem:[#allocation31_spill]] %s3198_s14 }
   0xa   :  { %20 = vsyncpa [#allocation4], 0 }
   0xb   :  { %22 = vsyncpa [#allocation4 + $0x1], 0 }
   0xc   :  { %23 = vsyncpa [#allocation7], 0 }
   0xd   :  { %24 = vsyncpa [#allocation10], 0 }
   0xe   :  { %25 = vsyncpa [#allocation13], 0 }
   0xf   :  { %26 = vsyncpa [#allocation5], 0 }
  0x10   :  { %28 = vsyncpa [#allocation5 + $0x1], 0 }
  0x11   :  { %29 = vsyncpa [#allocation16], 0 }
  0x12   :  { %31 = vsyncpa [#allocation16 + $0x1], 0  ;;  %s2716_s29 = smov 0   ;;  %s2718_s30 = smov 0  }
  0x13   :  { %s2720_s15 = smov 0   ;;  %s2722_s16 = smov 0  }
  0x14 LB: > { %s2626_s17 = smov [#allocation6]   ;;  %s2737_s19 = sadd.s32 4294967295, %s2624_s16   ;;  %s2624_s16 = sphi %s2722_s16, %s3247_s16   ;;  %s2620_s15 = sphi %s2720_s15, %s3246_s15   ;;  %s2616_s30 = sphi %s2718_s30, %s3245_s30   ;;  %s2612_s29 = sphi %s2716_s29, %s3244_s29  }
  0x15   : > { %s389_s18 = sshll.u32 %s2626_s17, 4  ;;  %p1869_p0 = scmp.ge.s32.totalorder %s2624_s16, 1  ;;  %s2742_s18 = int_to_ptr.vmem [resolvable:$true] %s389_s18 }
  0x16   : > { %p3201_p1 = scmp.eq.s32.totalorder %s2737_s19, 0  ;;  %p377_p2 = scmp.lt.s32.totalorder %s2624_s16, 3 }
  0x17   : > { %s2627_s21 = smov [#allocation9]   ;;  %s2628_s24 = smov [#allocation8]  }
  0x18   : > { %p2744_p3 = pnand %p1869_p0, %p377_p2  ;;  %s415_s22 = sshll.u32 %s2627_s21, 4  ;;  %s2757_s22 = int_to_ptr.vmem [resolvable:$true] %s415_s22 }
  0x19   : > { %s402_s25 = sshll.u32 %s2628_s24, 4  ;;  %s3217_s2 = sld [smem:[#allocation25_spill]]  ;;  %s2759_s25 = int_to_ptr.vmem [resolvable:$true] %s402_s25 }
  0x1a   : > { %s3215_s20 = scalar_select %p2744_p3, 1, 0 }
  0x1b   : > { %p2191_p5 = pneg %p2744_p3 }
  0x1d   : > { %p2753_p6 = pnand %p2191_p5, %p3201_p1 }
  0x1f   : > { %s2344_s28 = scalar_lea.hbm %s3217_s2, 512  ;;  %p2769_p8 = pneg %p2753_p6 }
  0x20   : > { %p2345_p7 = scmp.ne.s32.totalorder %s3217_s2, %s2344_s28  ;;  %p2351_p11 = scmp.lt.u32.totalorder %s2344_s28, %s3217_s2 }
  0x22   : > { %p2347_p9 = pnand %p2769_p8, %p2345_p7 }
  0x24   : > { %p2348_p10 = pneg %p2347_p9 }
  0x26   : > { %p2353_p12 = pnand %p2351_p11, %p2348_p10 }
  0x28   : > { %2356 = shalt.err (!%p2353_p12)
}
  0x29   : > { %s2357_s14 = scalar_lea.vmem %s2742_s18, 512  ;;  %p2365_p5 = scmp.lt.s32.totalorder %s2742_s18, %s2742_s18 }
  0x2a   : > { %p2358_p13 = scmp.ne.s32.totalorder %s2742_s18, %s2357_s14  ;;  %p2366_p4 = scmp.lt.s32.totalorder %s2357_s14, %s2357_s14 }
  0x2c   : > { %p2360_p0 = pnand %p2358_p13, %p2769_p8  ;;  %p2367_p7 = por %p2366_p4, %p2365_p5 }
  0x2e   : > { %p2361_p2 = pneg %p2360_p0 }
  0x30   : > { %p2368_p9 = pnand %p2367_p7, %p2361_p2 }
  0x32   : > { %2371 = shalt.err (!%p2368_p9)
}
  0x33   : > { %s3203_s26 = smov 64   ;;  %s2630_s13 = smov 4  }
  0x34   : > { %2194 = dma.hbm_to_vmem [thread:$0]  (!%p2753_p6), %s3217_s2, 512, %s2742_s18, [#allocation7], %s3203_s26, %s3203_s26, %s2630_s13  }
  0x35   : > { %s2372_s14 = scalar_lea.hbm %s3188_s4, 1536 }
  0x36   : > { %p2373_p4 = scmp.ne.s32.totalorder %s3188_s4, %s2372_s14  ;;  %p2379_p12 = scmp.lt.u32.totalorder %s2372_s14, %s3188_s4 }
  0x38   : > { %p2375_p10 = pnand %p2373_p4, %p2769_p8 }
  0x3a   : > { %p2376_p11 = pneg %p2375_p10 }
  0x3c   : > { %p2381_p13 = pnand %p2379_p12, %p2376_p11 }
  0x3e   : > { %2384 = shalt.err (!%p2381_p13)
}
  0x3f   : > { %s2385_s18 = scalar_lea.vmem %s2757_s22, 1536  ;;  %p2393_p7 = scmp.lt.s32.totalorder %s2757_s22, %s2757_s22 }
  0x40   : > { %p2386_p0 = scmp.ne.s32.totalorder %s2757_s22, %s2385_s18  ;;  %p2394_p9 = scmp.lt.s32.totalorder %s2385_s18, %s2385_s18 }
  0x42   : > { %p2388_p2 = pnand %p2386_p0, %p2769_p8  ;;  %p2395_p4 = por %p2394_p9, %p2393_p7 }
  0x44   : > { %p2389_p5 = pneg %p2388_p2 }
  0x46   : > { %p2396_p10 = pnand %p2395_p4, %p2389_p5 }
  0x48   : > { %2399 = shalt.err (!%p2396_p10)
}
  0x49   : > { %2200 = dma.hbm_to_vmem [thread:$0]  (!%p2753_p6), %s3188_s4, 1536, %s2757_s22, [#allocation10], %s3203_s26, %s3203_s26, %s2630_s13  }
  0x4a   : > { %s3219_s3 = sld [smem:[#allocation26_spill]] }
  0x50   : > { %s2400_s27 = scalar_lea.hbm %s3219_s3, 1536 }
  0x51   : > { %p2401_p11 = scmp.ne.s32.totalorder %s3219_s3, %s2400_s27  ;;  %p2407_p0 = scmp.lt.u32.totalorder %s2400_s27, %s3219_s3 }
  0x53   : > { %p2403_p12 = pnand %p2401_p11, %p2769_p8 }
  0x55   : > { %p2404_p13 = pneg %p2403_p12 }
  0x57   : > { %p2409_p2 = pnand %p2407_p0, %p2404_p13 }
  0x59   : > { %2412 = shalt.err (!%p2409_p2)
}
  0x5a   : > { %s2413_s22 = scalar_lea.vmem %s2759_s25, 1536  ;;  %p2421_p4 = scmp.lt.s32.totalorder %s2759_s25, %s2759_s25 }
  0x5b   : > { %p2414_p5 = scmp.ne.s32.totalorder %s2759_s25, %s2413_s22  ;;  %p2422_p10 = scmp.lt.s32.totalorder %s2413_s22, %s2413_s22 }
  0x5d   : > { %p2416_p7 = pnand %p2414_p5, %p2769_p8  ;;  %p2423_p11 = por %p2422_p10, %p2421_p4 }
  0x5f   : > { %p2417_p9 = pneg %p2416_p7 }
  0x61   : > { %p2424_p12 = pnand %p2423_p11, %p2417_p9 }
  0x63   : > { %2427 = shalt.err (!%p2424_p12)
}
  0x64   : > { %2197 = dma.hbm_to_vmem [thread:$0]  (!%p2753_p6), %s3219_s3, 1536, %s2759_s25, [#allocation7], %s3203_s26, %s3203_s26, %s2630_s13  }
  0x65   : > { %s2631_s8 = smov [#allocation11]   ;;  %s2632_s12 = smov [#allocation12]  }
  0x66   : > { %s428_s11 = sshll.u32 %s2631_s8, 4  ;;  %s453_s27 = sshll.u32 %s2632_s12, 4  ;;  %s429_s11 = int_to_ptr.vmem [resolvable:$true] %s428_s11  ;;  %s454_s27 = int_to_ptr.vmem [resolvable:$true] %s453_s27 }
  0x67   : > { %s2428_s24 = scalar_lea.hbm %s3189_s5, 512 }
  0x68   : > { %p2429_p13 = scmp.ne.s32.totalorder %s3189_s5, %s2428_s24  ;;  %p2435_p5 = scmp.lt.u32.totalorder %s2428_s24, %s3189_s5 }
  0x6a   : > { %p2431_p0 = pnand %p2429_p13, %p2769_p8 }
  0x6c   : > { %p2432_p2 = pneg %p2431_p0 }
  0x6e   : > { %p2437_p7 = pnand %p2435_p5, %p2432_p2 }
  0x70   : > { %2440 = shalt.err (!%p2437_p7)
}
  0x71   : > { %s2441_s25 = scalar_lea.vmem %s429_s11, 512  ;;  %p2449_p11 = scmp.lt.s32.totalorder %s429_s11, %s429_s11 }
  0x72   : > { %p2442_p9 = scmp.ne.s32.totalorder %s429_s11, %s2441_s25  ;;  %p2450_p12 = scmp.lt.s32.totalorder %s2441_s25, %s2441_s25 }
  0x74   : > { %p2444_p4 = pnand %p2442_p9, %p2769_p8  ;;  %p2451_p1 = por %p2450_p12, %p2449_p11 }
  0x76   : > { %p2445_p10 = pneg %p2444_p4 }
  0x78   : > { %p2452_p3 = pnand %p2451_p1, %p2445_p10 }
  0x7a   : > { %2455 = shalt.err (!%p2452_p3)
}
  0x7b   : > { %2203 = dma.hbm_to_vmem [thread:$0]  (!%p2753_p6), %s3189_s5, 512, %s429_s11, [#allocation10], %s3203_s26, %s3203_s26, %s2630_s13  }
  0x7c   : > { %s2456_s28 = scalar_lea.hbm %s3194_s10, 4096 }
  0x7d   : > { %p2457_p1 = scmp.ne.s32.totalorder %s3194_s10, %s2456_s28  ;;  %p2463_p0 = scmp.lt.u32.totalorder %s2456_s28, %s3194_s10 }
  0x7f   : > { %p2459_p3 = pnand %p2457_p1, %p2769_p8 }
  0x81   : > { %p2460_p13 = pneg %p2459_p3 }
  0x83   : > { %p2465_p2 = pnand %p2463_p0, %p2460_p13 }
  0x85   : > { %2468 = shalt.err (!%p2465_p2)
}
  0x86   : > { %s2469_s18 = scalar_lea.vmem %s454_s27, 4096  ;;  %p2477_p4 = scmp.lt.s32.totalorder %s454_s27, %s454_s27 }
  0x87   : > { %p2470_p5 = scmp.ne.s32.totalorder %s454_s27, %s2469_s18  ;;  %p2478_p10 = scmp.lt.s32.totalorder %s2469_s18, %s2469_s18 }
  0x89   : > { %p2472_p7 = pnand %p2470_p5, %p2769_p8  ;;  %p2479_p11 = por %p2478_p10, %p2477_p4 }
  0x8b   : > { %p2473_p9 = pneg %p2472_p7 }
  0x8d   : > { %p2480_p12 = pnand %p2479_p11, %p2473_p9 }
  0x8f   : > { %2483 = shalt.err (!%p2480_p12)
}
  0x90   : > { %2206 = dma.hbm_to_vmem [thread:$0]  (!%p2753_p6), %s3194_s10, 4096, %s454_s27, [#allocation13], %s3203_s26, %s3203_s26, %s2630_s13  }
  0x91   : > { %s1868_s23 = sadd.s32 4294967294, %s2624_s16   ;;  %s2889_s21 = sadd.s32 1, %s2624_s16  }
  0x92   : > { %s44_s2 = sadd.s32 1, %s2620_s15  ;;  %s41_s1 = ssub.s32 %s2624_s16, %s2889_s21 }
  0x93   : > { %p51_p8 = scmp.ne.s32.totalorder %s2620_s15, %s2616_s30  ;;  %p42_p1 = scmp.eq.s32.totalorder %s41_s1, 0 }
  0x94   : > { %p52_p3 = scmp.eq.s32.totalorder %s2624_s16, 0  ;;  %p57_p13 = scmp.ne.s32.totalorder %s2616_s30, %s2612_s29 }
  0x95   : > { %p338_p0 = scmp.eq.s32.totalorder %s2737_s19, 1  ;;  %p3220_p5 = scmp.eq.s32.totalorder %s2737_s19, 0 }
  0x96   : > { %s2901_s8 = scalar_select %p42_p1, %s2620_s15, %s44_s2  }
  0x97   : > { %p53_p2 = por %p52_p3, %p51_p8  ;;  %p2905_p7 = por %p3220_p5, %p57_p13 }
  0x98   : > { %p2909_p6 = por %p338_p0, %p51_p8  ;;  %p344_p9 = scmp.eq.s32.totalorder %s1868_s23, 1 }
  0x99   : > { %p2223_p4 = scmp.lt.s32.totalorder %s2624_s16, 2  ;;  %s473_s28 = sand.u32 1, %s2620_s15  }
  0x9a   : > { %s3222_s27 = scalar_select %p2909_p6, 1, 0 }
  0x9b   : > { %p2915_p10 = por %p344_p9, %p57_p13  ;;  %s1876_s24 = sshll.u32 %s473_s28, 3 }
  0x9c   : > { %s1982_s14 = sshll.u32 %s2624_s16, 7  ;;  %s3224_s0 = sld [smem:[#allocation23_spill]] }
  0x9d   : > { %s3223_s17 = scalar_select %p2915_p10, 1, 0 }
  0x9e   : > { %s477_s25 = scalar_lea.vmem [#allocation3], %s1876_s24  ;;  %p2925_p11 = pnand %p2223_p4, %p53_p2 }
  0x9f   : > { %s484_s2 = sshll.u32 %s477_s25, 4  ;;  %s2931_s1 = scalar_lea.sflag [#allocation4], %s473_s28  ;;  %s2929_s2 = int_to_ptr.vmem [resolvable:$true] %s484_s2 }
  0xa0   : > { %p2486_p8 = pneg %p2925_p11 }
  0xa2   : > { %s2923_s11 = scalar_lea.hbm %s3224_s0, %s1982_s14  ;;  %s2489_s22 = scalar_lea.hbm %s3224_s0, 256 }
  0xa3   : > { %s2484_s26 = scalar_lea.hbm %s2923_s11, 128  ;;  %p2490_p13 = scmp.lt.u32.totalorder %s2923_s11, %s3224_s0 }
  0xa4   : > { %p2485_p12 = scmp.ne.s32.totalorder %s2923_s11, %s2484_s26  ;;  %p2491_p0 = scmp.lt.u32.totalorder %s2489_s22, %s2484_s26 }
  0xa5   : > { %p2493_p5 = scmp.lt.u32.totalorder %s2484_s26, %s2923_s11 }
  0xa6   : > { %p2487_p1 = pnand %p2486_p8, %p2485_p12  ;;  %p2492_p2 = por %p2491_p0, %p2490_p13 }
  0xa8   : > { %p2488_p3 = pneg %p2487_p1  ;;  %p2494_p9 = por %p2493_p5, %p2492_p2 }
  0xaa   : > { %p2495_p4 = pnand %p2494_p9, %p2488_p3 }
  0xac   : > { %2498 = shalt.err (!%p2495_p4)
}
  0xad   : > { %s2499_s28 = scalar_lea.vmem %s2929_s2, 128  ;;  %s2633_s24 = smov [#allocation3]  }
  0xae   : > { %p2500_p12 = scmp.ne.s32.totalorder %s2929_s2, %s2499_s28  ;;  %s2504_s14 = sshll.u32 %s2633_s24, 4  ;;  %s2505_s14 = int_to_ptr.vmem [resolvable:$false] %s2504_s14 }
  0xaf   : > { %s2506_s18 = scalar_lea.vmem %s2505_s14, 256  ;;  %p2507_p6 = scmp.lt.s32.totalorder %s2929_s2, %s2505_s14 }
  0xb0   : > { %p2502_p1 = pnand %p2500_p12, %p2486_p8  ;;  %p2508_p13 = scmp.lt.s32.totalorder %s2506_s18, %s2499_s28 }
  0xb2   : > { %p2503_p10 = pneg %p2502_p1  ;;  %p2509_p0 = por %p2508_p13, %p2507_p6 }
  0xb4   : > { %p2510_p2 = pnand %p2509_p0, %p2503_p10 }
  0xb6   : > { %2513 = shalt.err (!%p2510_p2)
}
  0xb7   : > { %s3226_s26 = smov 64   ;;  %p3227_p8 = scmp.ne.s32.totalorder %s3215_s20, 0 }
  0xb8   : > { %2210 = dma.hbm_to_vmem [thread:$0]  (!%p2925_p11), %s2923_s11, 128, %s2929_s2, %s2931_s1, %s3226_s26, %s3226_s26, %s2630_s13  }
  0xb9   : > { %502 = sbr.rel (%p3227_p8) target bundleno = 749 (0x2ed), region = 72  ;;  %s2965_s22 = sand.u32 (!%p3227_p8), 1, %s2616_s30  }
  0xba   : > { %s1880_s25 = sshll.u32 (!%p3227_p8), %s2965_s22, 3  ;;  %s505_s28 = scalar_lea.sflag (!%p3227_p8), [#allocation4], %s2965_s22 }
  0xbb   : > { %s2969_s24 = scalar_lea.vmem (!%p3227_p8), [#allocation3], %s1880_s25 }
  0xc0   : > { %2587 = dma.done.wait (%p2905_p7), %s505_s28, 128  }
  0xc1   : > { %2589 = vsyncadd (%p2905_p7), %s505_s28, 4294967168  ;;  %p3228_p6 = scmp.eq.s32.totalorder %s2737_s19, 0 }
  0xc3   : > { %2591 = dma.done.wait (%p3228_p6), [#allocation7], 2048   ;;  %p3229_p10 = pmov %p3228_p6 }
  0xc4   : > { %p3230_p11 = pmov %p3228_p6 }
  0xc5   : > { %2593 = vsyncadd (%p3229_p10), [#allocation7], 4294965248 }
  0xc6   : > { %2595 = dma.done.wait (%p3230_p11), [#allocation10], 2048   ;;  %p3231_p3 = pmov %p3228_p6 }
  0xc8   : > { %2597 = vsyncadd (%p3231_p3), [#allocation10], 4294965248  ;;  %p3232_p5 = pmov %p3231_p3 }
  0xc9   : > { %p3233_p9 = pmov %p3231_p3 }
  0xca   : > { %2599 = dma.done.wait (%p3232_p5), [#allocation13], 4096  }
  0xcb   : > { %2601 = vsyncadd (%p3233_p9), [#allocation13], 4294963200  ;;  %vm587_vm0 = vcmask 519168   ;;  %v2634_v0 = vmov 0.0   ;;  %v2635_v1 = vmov 0   ;;  %vm589_vm1 = vcmask 517120  }
  0xcc   : > { %2069 = vmatprep.subr.bf16.mxu0 %v2634_v0  ;;  %2081 = vmatprep.subr.bf16.mxu1 %v2634_v0  ;;  %588 = vst.msk [vmem:[#allocation2] sm:$0xf] %vm587_vm0, %v2635_v1  ;;  %vm591_vm2 = vcmask 519170   ;;  %593 = vst.msk [vmem:[#allocation2 + $0x10] sm:$0xf] %vm587_vm0, %v2635_v1  ;;  %vm2636_vm3 = vmmov 0  }
  0xcd   : > { %2077 = vmatprep.mubr.msk.bf16.mxu0 %vm2636_vm3, %v2634_v0  ;;  %2089 = vmatprep.mubr.msk.bf16.mxu1 %vm2636_vm3, %v2634_v0  ;;  %590 = vst.msk [vmem:[#allocation2 + $0x4] sm:$0x3] %vm589_vm1, %v2635_v1  ;;  %v2274_v2 = vld [vmem:[#allocation6] sm:$0xff]   ;;  %v2276_v4 = vld [vmem:[#allocation6 + $0x8] sm:$0xff]   ;;  %vm596_vm4 = vcmask 1041408   ;;  %v2278_v6 = vld [vmem:[#allocation6 + $0x10] sm:$0xff]  }
  0xce   : > { %592 = vst.msk [vmem:[#allocation2 + $0xc] sm:$0xc] %vm591_vm2, %v2635_v1  ;;  %v2275_v3 = vld [vmem:[#allocation8 + $0x20] sm:$0xff]   ;;  %2070 = vmatpush3.bf16.msra.mxu0 %v2274_v2  ;;  %v2277_v5 = vld [vmem:[#allocation8 + $0x28] sm:$0xff]   ;;  %vm597_vm5 = vcmask 1045508   ;;  %v2279_v7 = vld [vmem:[#allocation8 + $0x30] sm:$0xff]  }
  0xcf   : > { %2082 = vmatpush3.bf16.msra.mxu1 %v2275_v3  ;;  %2071 = vmatprep.subr.bf16.mxu0 %v2634_v0  ;;  %v585_v8 = vld [vmem:[%s2969_s24] sm:$0xf]  ;;  %v586_v9 = vld [vmem:[%s2969_s24 + $0x4] sm:$0xf]  ;;  %vm598_vm6 = vmor %vm596_vm4, %vm597_vm5  ;;  %vm652_vm7 = vcmask 523264   ;;  %vm792_vm8 = vcmask 1044480  }
  0xd0   : > { %2083 = vmatprep.subr.bf16.mxu1 %v2634_v0  ;;  %v2280_v10 = vld [vmem:[#allocation6 + $0x18] sm:$0xff]   ;;  %v599_v11 = vrot.slane %v585_v8, 6  ;;  %v601_v12 = vrot.slane %v586_v9, 6  ;;  %v3007_v17 = vcombine.low %v585_v8, %v586_v9  ;;  %v2282_v18 = vld [vmem:[#allocation8] sm:$0xff]   ;;  %v2284_v20 = vld [vmem:[#allocation8 + $0x8] sm:$0xff]   ;;  %vm883_vm9 = vcmask 1046528  }
  0xd1   : > { %v2281_v13 = vld [vmem:[#allocation8 + $0x38] sm:$0xff]   ;;  %v2283_v19 = vld [vmem:[#allocation8 + $0x40] sm:$0xff]   ;;  %v2285_v21 = vld [vmem:[#allocation8 + $0x48] sm:$0xff]   ;;  %s3234_s18 = sld [smem:[#allocation27_spill]]  ;;  %p581_p7 = scmp.lt.s32.totalorder %s2737_s19, 1 }
  0xd2   : > { %2072 = vmatpush3.bf16.msra.mxu0 %v2276_v4  ;;  %v600_v14 = vrot.slane %v599_v11, 4  ;;  %v603_v15 = vrot.slane %v601_v12, 4  ;;  %607 = vst.msk [vmem:[#allocation2 + $0x4] sm:$0xc] %vm591_vm2, %v599_v11  ;;  %v2286_v24 = vld [vmem:[#allocation8 + $0x10] sm:$0xff]   ;;  %v2288_v30 = vld [vmem:[#allocation8 + $0x18] sm:$0xff]  }
  0xd3   : > { %2084 = vmatpush3.bf16.msra.mxu1 %v2277_v5  ;;  %2073 = vmatprep.subr.bf16.mxu0 %v2634_v0  ;;  %v2293_v26 = vld [vmem:[#allocation2 + $0x10] ss:$0 sps:$4 sm:$0x11]   ;;  %v2287_v28 = vld [vmem:[#allocation8 + $0x50] sm:$0xff]   ;;  %v2289_v31 = vld [vmem:[#allocation8 + $0x58] sm:$0xff]   ;;  %s582_s26 = scalar_select %p581_p7, %s2737_s19, 1 }
  0xd4   : > { %2085 = vmatprep.subr.bf16.mxu1 %v2634_v0  ;;  %v602_v16 = vsel %vm598_vm6, %v600_v14, %v601_v12  ;;  %609 = vst.msk [vmem:[#allocation2 + $0xc] sm:$0x3] %vm589_vm1, %v603_v15  ;;  %v885_v35 = vrot.slane %v2293_v26, 1  ;;  %v2294_v37 = vld [vmem:[#allocation9 + $0x20] sm:$0xff]   ;;  %v2296_v40 = vld [vmem:[#allocation9 + $0x28] sm:$0xff]   ;;  %v2298_v42 = vld [vmem:[#allocation9 + $0x30] sm:$0xff]  }
  0xd5   : > { %608 = vst.msk [vmem:[#allocation2 + $0x8] sm:$0xf] %vm587_vm0, %v602_v16  ;;  %v2295_v39 = vld [vmem:[#allocation9] sm:$0xff]   ;;  %v2297_v41 = vld [vmem:[#allocation9 + $0x8] sm:$0xff]   ;;  %v2299_v43 = vld [vmem:[#allocation9 + $0x10] sm:$0xff]   ;;  %s3235_s24 = sld [smem:[#allocation24_spill]] }
  0xd6   : > { %2074 = vmatpush3.bf16.msra.mxu0 %v2278_v6  ;;  %v2300_v44 = vld [vmem:[#allocation9 + $0x38] sm:$0xff]   ;;  %v2303_v47 = vld [vmem:[#allocation9 + $0x40] sm:$0xff]   ;;  %v2305_v49 = vld [vmem:[#allocation9 + $0x48] sm:$0xff]   ;;  %s1886_s13 = sshll.u32 %s2965_s22, 4  ;;  %s3205_s2 = sshll.u32 %s2737_s19, 8 }
  0xd7   : > { %2086 = vmatpush3.bf16.msra.mxu1 %v2279_v7  ;;  %2075 = vmatprep.subr.bf16.mxu0 %v2634_v0  ;;  %v2301_v45 = vld [vmem:[#allocation9 + $0x18] sm:$0xff]   ;;  %v2304_v48 = vld [vmem:[#allocation11] sm:$0xff]   ;;  %v2306_v50 = vld [vmem:[#allocation11 + $0x8] sm:$0xff]   ;;  %s573_s12 = scalar_lea.vmem [#allocation14], %s1886_s13  ;;  %s3236_s14 = sld [smem:[#allocation28_spill]] }
  0xd8   : > { %2087 = vmatprep.subr.bf16.mxu1 %v2634_v0  ;;  %v2307_v51 = vld [vmem:[#allocation9 + $0x50] sm:$0xff]   ;;  %v2309_v53 = vld [vmem:[#allocation9 + $0x58] sm:$0xff]   ;;  %v1125_v54 = vld [vmem:[#allocation2 + $0x10] sm:$0xf]  ;;  %s1690_s11 = sshll.u32 %s573_s12, 4  ;;  %s3237_s25 = sld [smem:[#allocation29_spill]]  ;;  %s3084_s11 = int_to_ptr.vmem [resolvable:$true] %s1690_s11 }
  0xd9   : > { %v2290_v22 = vld [vmem:[#allocation2] sm:$0xf8]   ;;  %v2308_v52 = vld [vmem:[#allocation11 + $0x10] sm:$0xff]   ;;  %v2314_v59 = vld [vmem:[#allocation12 + $0x48] sm:$0xff]   ;;  %s3096_s1 = scalar_lea.vmem [#allocation15], %s1886_s13  ;;  %s1672_s0 = scalar_lea.sflag [#allocation5], %s2965_s22 }
  0xda   : > { %2076 = vmatpush3.bf16.msra.mxu0 %v2280_v10  ;;  %v793_v32 = vrot.slane %v2290_v22, 3  ;;  %v2302_v46 = vld [vmem:[#allocation2] sm:$0xff]   ;;  %v2315_v60 = vld [vmem:[#allocation12 + $0x8] sm:$0xff]   ;;  %v2316_v61 = vld [vmem:[#allocation12 + $0x50] sm:$0xff]   ;;  %p3239_p12 = scmp.ne.s32.totalorder %s3222_s27, 0 }
  0xdb   : > { %2088 = vmatpush3.bf16.msra.mxu1 %v2281_v13  ;;  %2093 = vmatprep.subr.bf16.mxu0 %v2634_v0  ;;  %v3020_v23 = vld [vmem:[#allocation2 + $0xc] sm:$0xf]  ;;  %v2310_v55 = vld [vmem:[#allocation11 + $0x18] sm:$0xff]   ;;  %v2312_v56 = vld [vmem:[#allocation12 + $0x40] sm:$0xff]   ;;  %s583_s20 = scalar_lea.vmem %s3235_s24, %s582_s26  ;;  %s2637_s26 = smov [#allocation14]  }
  0xdc   : > { %2105 = vmatprep.subr.bf16.mxu1 %v2634_v0  ;;  %v2291_v25 = vld [vmem:[#allocation2 + $0x8] ss:$0 sps:$4 sm:$0x77]   ;;  %v864_v27 = vld [vmem:[#allocation2 + $0x8] sm:$0xe]  ;;  %v1926_v57 = vcombine.low %v3020_v23, %v1125_v54  ;;  %v2317_v62 = vld [vmem:[#allocation12 + $0x10] sm:$0xff]  }
  0xdd   : > { %2078 = vmatmul.mubr.msk.bf16.vlgmr.msra.gmra.mrb[0].mxu0 %vm652_vm7, %v3007_v17  ;;  %v1907_v29 = vcombine.low %v864_v27, %v3020_v23  ;;  %v794_v33 = vrot.slane %v2291_v25, 3  ;;  %v2313_v58 = vld [vmem:[#allocation12] sm:$0xff]   ;;  %v2318_v63 = vld [vmem:[#allocation12 + $0x58] sm:$0xff]   ;;  %v2322_v3 = vld [vmem:[#allocation12 + $0x68] sm:$0xff]  }
  0xde   : > { %2090 = vmatmul.mubr.msk.bf16.vlgmr.msra.gmra.mrb[0].mxu1 %vm652_vm7, %v3007_v17  ;;  %2094 = vmatpush3.bf16.msra.mxu0 %v2282_v18  ;;  %v2320_v1 = vld [vmem:[#allocation12 + $0x60] sm:$0xff]   ;;  %v2323_v4 = vld [vmem:[#allocation12 + $0x28] sm:$0xff]   ;;  %v2324_v5 = vld [vmem:[#allocation12 + $0x70] sm:$0xff]  }
  0xdf   : > { %2106 = vmatpush3.bf16.msra.mxu1 %v2283_v19  ;;  %2095 = vmatprep.subr.bf16.mxu0 %v2634_v0  ;;  %v884_v34 = vrot.slane %v1907_v29, 1  ;;  %v795_v36 = vsel %vm792_vm8, %v793_v32, %v794_v33  ;;  %v2321_v2 = vld [vmem:[#allocation12 + $0x20] sm:$0xff]   ;;  %v2325_v6 = vld [vmem:[#allocation12 + $0x30] sm:$0xff]   ;;  %v2326_v7 = vld [vmem:[#allocation12 + $0x78] sm:$0xff]  }
  0xe0   : > { %2107 = vmatprep.subr.bf16.mxu1 %v2634_v0  ;;  %2101 = vmatprep.mubr.msk.bf16.mxu0 %vm2636_vm3, %v2634_v0  ;;  %v2327_v8 = vld [vmem:[#allocation12 + $0x38] sm:$0xff]   ;;  %v2328_v9 = vld [vmem:[#allocation12 + $0xc0] sm:$0xff]   ;;  %v2330_v11 = vld [vmem:[#allocation12 + $0xc8] sm:$0xff]  }
  0xe1   : > { %2113 = vmatprep.mubr.msk.bf16.mxu1 %vm2636_vm3, %v2634_v0  ;;  %v886_v38 = vsel %vm883_vm9, %v884_v34, %v885_v35  ;;  %v2329_v10 = vld [vmem:[#allocation12 + $0x80] sm:$0xff]   ;;  %v2331_v12 = vld [vmem:[#allocation12 + $0x88] sm:$0xff]   ;;  %v2332_v13 = vld [vmem:[#allocation12 + $0xd0] sm:$0xff]  }
  0xe2   : > { %2096 = vmatpush3.bf16.msra.mxu0 %v2284_v20  ;;  %v2333_v14 = vld [vmem:[#allocation12 + $0x90] sm:$0xff]   ;;  %v2334_v15 = vld [vmem:[#allocation12 + $0xd8] sm:$0xff]   ;;  %v2337_v18 = vld [vmem:[#allocation12 + $0xa0] sm:$0xff]  }
  0xe3   : > { %2108 = vmatpush3.bf16.msra.mxu1 %v2285_v21  ;;  %2097 = vmatprep.subr.bf16.mxu0 %v2634_v0  ;;  %v2335_v16 = vld [vmem:[#allocation12 + $0x98] sm:$0xff]   ;;  %v2338_v19 = vld [vmem:[#allocation12 + $0xe8] sm:$0xff]   ;;  %v2340_v21 = vld [vmem:[#allocation12 + $0xf0] sm:$0xff]  }
  0xe4   : > { %2109 = vmatprep.subr.bf16.mxu1 %v2634_v0  ;;  %v2339_v20 = vld [vmem:[#allocation12 + $0xa8] sm:$0xff]   ;;  %v2341_v22 = vld [vmem:[#allocation12 + $0xb0] sm:$0xff]   ;;  %v2342_v23 = vld [vmem:[#allocation12 + $0xf8] sm:$0xff]  }
  0xe5   : > { %v1888_v25 = vld [vmem:[%s3190_s6] ss:$0 sm:$0xff] }
  0xe6   : > { %2098 = vmatpush3.bf16.msra.mxu0 %v2286_v24  ;;  %v2343_v24 = vld [vmem:[#allocation12 + $0xb8] sm:$0xff]  }
  0xe7   : > { %2110 = vmatpush3.bf16.msra.mxu1 %v2287_v28  ;;  %2099 = vmatprep.subr.bf16.mxu0 %v2634_v0 }
  0xe8   : > { %2111 = vmatprep.subr.bf16.mxu1 %v2634_v0 }
  0xea   : > { %2100 = vmatpush3.bf16.msra.mxu0 %v2288_v30 }
  0xeb   : > { %2112 = vmatpush3.bf16.msra.mxu1 %v2289_v31  ;;  %2117 = vmatprep.subr.bf16.mxu0 %v2634_v0 }
  0xec   : > { %2129 = vmatprep.subr.bf16.mxu1 %v2634_v0 }
  0xed   : > { %2102 = vmatmul.mubr.msk.bf16.vlgmr.msra.gmra.mrb[4].mxu0 %vm652_vm7, %v795_v36 }
  0xee   : > { %2114 = vmatmul.mubr.msk.bf16.vlgmr.msra.gmra.mrb[4].mxu1 %vm652_vm7, %v886_v38  ;;  %2118 = vmatpush3.bf16.msra.mxu0 %v2294_v37 }
  0xef   : > { %2130 = vmatpush3.bf16.msra.mxu1 %v2295_v39  ;;  %2119 = vmatprep.subr.bf16.mxu0 %v2634_v0 }
  0xf0   : > { %2131 = vmatprep.subr.bf16.mxu1 %v2634_v0  ;;  %2125 = vmatprep.mubr.msk.bf16.mxu0 %vm2636_vm3, %v2634_v0 }
  0xf1   : > { %2137 = vmatprep.mubr.msk.bf16.mxu1 %vm2636_vm3, %v2634_v0 }
  0xf2   : > { %2120 = vmatpush3.bf16.msra.mxu0 %v2296_v40 }
  0xf3   : > { %2132 = vmatpush3.bf16.msra.mxu1 %v2297_v41  ;;  %2121 = vmatprep.subr.bf16.mxu0 %v2634_v0 }
  0xf4   : > { %2133 = vmatprep.subr.bf16.mxu1 %v2634_v0 }
  0xf6   : > { %2122 = vmatpush3.bf16.msra.mxu0 %v2298_v42 }
  0xf7   : > { %2134 = vmatpush3.bf16.msra.mxu1 %v2299_v43  ;;  %2123 = vmatprep.subr.bf16.mxu0 %v2634_v0  ;;  %v1914_v43 = vld [vmem:[%s3191_s7] ss:$0 sm:$0xff] }
  0xf8   : > { %2135 = vmatprep.subr.bf16.mxu1 %v2634_v0 }
  0xfa   : > { %2124 = vmatpush3.bf16.msra.mxu0 %v2300_v44 }
  0xfb   : > { %2136 = vmatpush3.bf16.msra.mxu1 %v2301_v45  ;;  %2141 = vmatprep.subr.bf16.mxu0 %v2634_v0 }
  0xfc   : > { %2153 = vmatprep.subr.bf16.mxu1 %v2634_v0 }
  0xfd   : > { %2126 = vmatmul.mubr.msk.bf16.vlgmr.msra.gmra.mrb[8].mxu0 %vm652_vm7, %v3007_v17 }
  0xfe   : > { %2138 = vmatmul.mubr.msk.bf16.vlgmr.msra.gmra.mrb[8].mxu1 %vm652_vm7, %v2302_v46  ;;  %2142 = vmatpush3.bf16.msra.mxu0 %v2303_v47 }
  0xff   : > { %2154 = vmatpush3.bf16.msra.mxu1 %v2304_v48  ;;  %2143 = vmatprep.subr.bf16.mxu0 %v2634_v0 }
 0x100   : > { %2155 = vmatprep.subr.bf16.mxu1 %v2634_v0  ;;  %2149 = vmatprep.mubr.msk.bf16.mxu0 %vm2636_vm3, %v2634_v0 }
 0x101   : > { %2161 = vmatprep.mubr.msk.bf16.mxu1 %vm2636_vm3, %v2634_v0 }
 0x102   : > { %2144 = vmatpush3.bf16.msra.mxu0 %v2305_v49 }
 0x103   : > { %2156 = vmatpush3.bf16.msra.mxu1 %v2306_v50  ;;  %2145 = vmatprep.subr.bf16.mxu0 %v2634_v0 }
 0x104   : > { %2157 = vmatprep.subr.bf16.mxu1 %v2634_v0 }
 0x106   : > { %2146 = vmatpush3.bf16.msra.mxu0 %v2307_v51 }
 0x107   : > { %2158 = vmatpush3.bf16.msra.mxu1 %v2308_v52  ;;  %2147 = vmatprep.subr.bf16.mxu0 %v2634_v0 }
 0x108   : > { %2159 = vmatprep.subr.bf16.mxu1 %v2634_v0  ;;  %v2319_v0 = vld [vmem:[#allocation12 + $0x18] sm:$0xff]  }
 0x10a   : > { %2148 = vmatpush3.bf16.msra.mxu0 %v2309_v53 }
 0x10b   : > { %2160 = vmatpush3.bf16.msra.mxu1 %v2310_v55  ;;  %2025 = vmatprep.subr.bf16.mxu0 %v2312_v56 }
 0x10c   : > { %2047 = vmatprep.subr.bf16.mxu1 %v2328_v9 }
 0x10d   : > { %2150 = vmatmul.mubr.msk.bf16.vlgmr.msra.gmra.mrb[12].mxu0 %vm652_vm7, %v1926_v57 }
 0x10e   : > { %2162 = vmatmul.mubr.msk.bf16.vlgmr.msra.gmra.mrb[12].mxu1 %vm652_vm7, %v3007_v17  ;;  %2026 = vmatpush3.bf16.msra.mxu0 %v2313_v58  ;;  %v2336_v17 = vld [vmem:[#allocation12 + $0xe0] sm:$0xff]  }
 0x10f   : > { %2027 = vmatprep.subr.bf16.mxu0 %v2314_v59  ;;  %2048 = vmatpush3.bf16.msra.mxu1 %v2329_v10 }
 0x110   : > { %2049 = vmatprep.subr.bf16.mxu1 %v2330_v11 }
 0x112   : > { %2028 = vmatpush3.bf16.msra.mxu0 %v2315_v60 }
 0x113   : > { %2029 = vmatprep.subr.bf16.mxu0 %v2316_v61  ;;  %2050 = vmatpush3.bf16.msra.mxu1 %v2331_v12 }
 0x114   : > { %2051 = vmatprep.subr.bf16.mxu1 %v2332_v13 }
 0x116   : > { %2030 = vmatpush3.bf16.msra.mxu0 %v2317_v62 }
 0x117   : > { %2031 = vmatprep.subr.bf16.mxu0 %v2318_v63  ;;  %2052 = vmatpush3.bf16.msra.mxu1 %v2333_v14 }
 0x118   : > { %2053 = vmatprep.subr.bf16.mxu1 %v2334_v15 }
 0x11a   : > { %2032 = vmatpush3.bf16.msra.mxu0 %v2319_v0 }
 0x11b   : > { %2033 = vmatprep.subr.bf16.mxu0 %v2320_v1  ;;  %2054 = vmatpush3.bf16.msra.mxu1 %v2335_v16 }
 0x11c   : > { %2055 = vmatprep.subr.bf16.mxu1 %v2336_v17 }
 0x11e   : > { %2034 = vmatpush3.bf16.msra.mxu0 %v2321_v2 }
 0x11f   : > { %2035 = vmatprep.subr.bf16.mxu0 %v2322_v3  ;;  %2056 = vmatpush3.bf16.msra.mxu1 %v2337_v18  ;;  %v1933_v3 = vld [vmem:[%s3193_s9] ss:$0 sm:$0xff] }
 0x120   : > { %2057 = vmatprep.subr.bf16.mxu1 %v2338_v19 }
 0x122   : > { %2036 = vmatpush3.bf16.msra.mxu0 %v2323_v4 }
 0x123   : > { %2037 = vmatprep.subr.bf16.mxu0 %v2324_v5  ;;  %2058 = vmatpush3.bf16.msra.mxu1 %v2339_v20  ;;  %v1932_v5 = vld [vmem:[%s3234_s18] ss:$0 sm:$0xff]  ;;  %s2514_s18 = scalar_lea.vmem %s3084_s11, 256 }
 0x124   : > { %2059 = vmatprep.subr.bf16.mxu1 %v2340_v21  ;;  %p2515_p4 = scmp.ne.s32.totalorder %s3084_s11, %s2514_s18 }
 0x126   : > { %2038 = vmatpush3.bf16.msra.mxu0 %v2325_v6  ;;  %p2516_p1 = pnand %p2515_p4, %p3239_p12 }
 0x127   : > { %2039 = vmatprep.subr.bf16.mxu0 %v2326_v7  ;;  %2060 = vmatpush3.bf16.msra.mxu1 %v2341_v22 }
 0x128   : > { %2061 = vmatprep.subr.bf16.mxu1 %v2342_v23  ;;  %p2517_p13 = pneg %p2516_p1 }
 0x12a   : > { %2040 = vmatpush3.bf16.msra.mxu0 %v2327_v8 }
 0x12b   : > { %2062 = vmatpush3.bf16.msra.mxu1 %v2343_v24 }
 0x1b0   : > { %v690_v26 = vpop.f32.mrb[0].mxu0 }
 0x1b1   : > { %v691_v27 = vadd.f32 %v1888_v25, %v690_v26  ;;  %v777_v28 = vpop.f32.mrb[0].mxu1  ;;  %v2079_v29 = vpop.f32.mrb[1].mxu0 }
 0x1b2   : > { %v2091_v30 = vpop.f32.mrb[1].mxu1  ;;  %v693_v31 = vpop.f32.mrb[2].mxu0 }
 0x1b3   : > { %v697_v32 = vmax.f32 %v691_v27, 0.0  ;;  %v694_v33 = vadd.f32 %v1888_v25, %v693_v31  ;;  %v780_v34 = vpop.f32.mrb[2].mxu1  ;;  %v2080_v35 = vpop.f32.mrb[3].mxu0  ;;  %v1939_v31 = vld [vmem:[%s583_s20] ss:$0 sm:$0xff]  ;;  %s3238_s20 = sld [smem:[#allocation30_spill]] }
 0x1b4   : > { %v2092_v36 = vpop.f32.mrb[3].mxu1 }
 0x1b5   : > { %v698_v37 = vmax.f32 %v694_v33, 0.0 }
 0x1b7   : > { %v699_v38 = vpack.c.bf16 %v698_v37, %v697_v32  ;;  %v1972_v37 = vld [vmem:[%s3236_s14] ss:$0 sm:$0xff]  ;;  %s1706_s14 = sshll.u32 %s3096_s1, 4  ;;  %s3128_s14 = int_to_ptr.vmem [resolvable:$true] %s1706_s14 }
 0x1b9   : > { %s3094_s23 = scalar_lea.hbm %s3238_s20, %s3205_s2 }
 0x1c0   : > { %v857_v39 = vpop.f32.mrb[4].mxu0 }
 0x1c1   : > { %v858_v40 = vadd.f32 %v857_v39, %v777_v28  ;;  %v948_v41 = vpop.f32.mrb[4].mxu1  ;;  %v2103_v42 = vpop.f32.mrb[5].mxu0 }
 0x1c2   : > { %v2115_v44 = vpop.f32.mrb[5].mxu1  ;;  %v860_v45 = vpop.f32.mrb[6].mxu0  ;;  %v1973_v42 = vld [vmem:[%s3237_s25] ss:$0 sm:$0xff]  ;;  %s2518_s25 = sshll.u32 %s2637_s26, 4  ;;  %s2519_s25 = int_to_ptr.vmem [resolvable:$false] %s2518_s25 }
 0x1c3   : > { %v955_v46 = vadd.f32 %v948_v41, %v858_v40  ;;  %v861_v47 = vadd.f32 %v860_v45, %v780_v34  ;;  %v951_v48 = vpop.f32.mrb[6].mxu1  ;;  %v2104_v49 = vpop.f32.mrb[7].mxu0  ;;  %s2520_s28 = scalar_lea.vmem %s2519_s25, 512  ;;  %p2521_p0 = scmp.lt.s32.totalorder %s3084_s11, %s2519_s25 }
 0x1c4   : > { %v2116_v50 = vpop.f32.mrb[7].mxu1  ;;  %p2522_p2 = scmp.lt.s32.totalorder %s2520_s28, %s2514_s18 }
 0x1c5   : > { %v964_v51 = vadd.f32 %v1914_v43, %v955_v46  ;;  %v956_v52 = vadd.f32 %v951_v48, %v861_v47 }
 0x1c6   : > { %p2523_p8 = por %p2522_p2, %p2521_p0 }
 0x1c7   : > { %v965_v53 = vadd.f32 %v1914_v43, %v956_v52  ;;  %v966_v54 = vmax.f32 %v964_v51, 0.0 }
 0x1c8   : > { %p2524_p6 = pnand %p2523_p8, %p2517_p13 }
 0x1c9   : > { %v967_v55 = vmax.f32 %v965_v53, 0.0 }
 0x1cb   : > { %v968_v56 = vpack.c.bf16 %v967_v55, %v966_v54 }
 0x1cd   : > { %1597 = vmatprep.mubr.bf16.mxu0 %v968_v56 }
 0x1ce   : > { %1598 = vmatmul.mubr.bf16.vlgmr.msra.gmra.mrb[16].mxu0 %v699_v38 }
 0x1d0   : > { %v1045_v57 = vpop.f32.mrb[8].mxu0 }
 0x1d1   : > { %v1118_v58 = vpop.f32.mrb[8].mxu1  ;;  %v2127_v59 = vpop.f32.mrb[9].mxu0 }
 0x1d2   : > { %v1119_v60 = vadd.f32 %v1118_v58, %v1045_v57  ;;  %v2139_v61 = vpop.f32.mrb[9].mxu1  ;;  %v1048_v62 = vpop.f32.mrb[10].mxu0 }
 0x1d3   : > { %v1121_v63 = vpop.f32.mrb[10].mxu1  ;;  %v2128_v0 = vpop.f32.mrb[11].mxu0 }
 0x1d4   : > { %v1122_v1 = vadd.f32 %v1121_v63, %v1048_v62  ;;  %v2140_v2 = vpop.f32.mrb[11].mxu1 }
 0x1e0   : > { %v1198_v4 = vpop.f32.mrb[12].mxu0 }
 0x1e1   : > { %v1205_v6 = vadd.f32 %v1198_v4, %v1119_v60  ;;  %v1292_v7 = vpop.f32.mrb[12].mxu1  ;;  %v2151_v8 = vpop.f32.mrb[13].mxu0 }
 0x1e2   : > { %v1293_v9 = vadd.f32 %v1933_v3, %v1292_v7  ;;  %v2163_v10 = vpop.f32.mrb[13].mxu1  ;;  %v1201_v11 = vpop.f32.mrb[14].mxu0 }
 0x1e3   : > { %v1214_v12 = vadd.f32 %v1932_v5, %v1205_v6  ;;  %v1206_v13 = vadd.f32 %v1201_v11, %v1122_v1  ;;  %v1295_v14 = vpop.f32.mrb[14].mxu1  ;;  %v2152_v15 = vpop.f32.mrb[15].mxu0 }
 0x1e4   : > { %v1299_v16 = vmax.f32 %v1293_v9, 0.0  ;;  %v1296_v17 = vadd.f32 %v1933_v3, %v1295_v14  ;;  %v2164_v18 = vpop.f32.mrb[15].mxu1 }
 0x1e5   : > { %v1215_v19 = vadd.f32 %v1932_v5, %v1206_v13  ;;  %v1216_v21 = vmax.f32 %v1214_v12, 0.0 }
 0x1e6   : > { %v1300_v20 = vmax.f32 %v1296_v17, 0.0 }
 0x1e7   : > { %v1217_v22 = vmax.f32 %v1215_v19, 0.0 }
 0x1e8   : > { %v1301_v23 = vpack.c.bf16 %v1300_v20, %v1299_v16 }
 0x1e9   : > { %v1218_v24 = vpack.c.bf16 %v1217_v22, %v1216_v21 }
 0x1ea   : > { %1638 = vmatprep.mubr.bf16.mxu1 %v1301_v23 }
 0x1eb   : > { %1639 = vmatmul.mubr.bf16.vlgmr.msra.gmra.mrb[16].mxu1 %v1218_v24 }
 0x2a1   : > { %v2041_v25 = vpop.f32.mrb[16].mxu0 }
 0x2a2   : > { %v2042_v26 = vpop.f32.mrb[17].mxu0 }
 0x2a3   : > { %v2043_v27 = vadd.f32 %v2042_v26, %v2041_v25  ;;  %v2044_v28 = vpop.f32.mrb[18].mxu0 }
 0x2a4   : > { %v2045_v29 = vpop.f32.mrb[19].mxu0 }
 0x2a5   : > { %v2046_v30 = vadd.f32 %v2045_v29, %v2044_v28  ;;  %v1600_v34 = vadd.f32 %v2043_v27, %v1939_v31 }
 0x2a7   : > { %v1603_v39 = vadd.f32 %v2046_v30, %v1939_v31 }
 0x2be   : > { %v2063_v32 = vpop.f32.mrb[16].mxu1 }
 0x2bf   : > { %v2064_v33 = vpop.f32.mrb[17].mxu1 }
 0x2c0   : > { %v2065_v35 = vadd.f32 %v2064_v33, %v2063_v32  ;;  %v2066_v36 = vpop.f32.mrb[18].mxu1 }
 0x2c1   : > { %v2067_v38 = vpop.f32.mrb[19].mxu1 }
 0x2c2   : > { %v1641_v40 = vadd.f32 %v2065_v35, %v1600_v34  ;;  %v2068_v41 = vadd.f32 %v2067_v38, %v2066_v36 }
 0x2c4   : > { %1647 = vst [vmem:[%s573_s12] sm:$0xff] %v1641_v40  ;;  %v1656_v43 = vmul.f32 %v1972_v37, %v1641_v40  ;;  %v1644_v44 = vadd.f32 %v2068_v41, %v1603_v39 }
 0x2c6   : > { %v1665_v45 = vadd.f32 %v1973_v42, %v1656_v43  ;;  %1648 = vst [vmem:[%s573_s12 + $0x8] sm:$0xff] %v1644_v44  ;;  %v1657_v46 = vmul.f32 %v1972_v37, %v1644_v44 }
 0x2c7   : > { %2527 = shalt.err (!%p2524_p6)
}
 0x2c8   : > { %s2528_s13 = scalar_lea.hbm %s3094_s23, 256  ;;  %s2532_s26 = scalar_lea.hbm %s3238_s20, 512 }
 0x2c9   : > { %p2529_p10 = scmp.ne.s32.totalorder %s3094_s23, %s2528_s13  ;;  %p2533_p5 = scmp.lt.u32.totalorder %s3094_s23, %s3238_s20 }
 0x2ca   : > { %p2534_p9 = scmp.lt.u32.totalorder %s2532_s26, %s2528_s13  ;;  %p2536_p4 = scmp.lt.u32.totalorder %s2528_s13, %s3094_s23 }
 0x2cb   : > { %p2530_p11 = pnand %p2529_p10, %p3239_p12 }
 0x2cc   : > { %p2535_p7 = por %p2534_p9, %p2533_p5 }
 0x2cd   : > { %p2531_p3 = pneg %p2530_p11 }
 0x2ce   : > { %p2537_p1 = por %p2536_p4, %p2535_p7 }
 0x2d0   : > { %p2538_p13 = pnand %p2537_p1, %p2531_p3 }
 0x2d2   : > { %2541 = shalt.err (!%p2538_p13)
}
 0x2d3   : > { %s2638_s18 = smov 128   ;;  %s2639_s28 = smov 8   ;;  %v1667_v47 = vmax.f32 %v1665_v45, 0.0  ;;  %v1666_v48 = vadd.f32 %v1973_v42, %v1657_v46 }
 0x2d4   : > { %2187 = dma.vmem_to_hbm [thread:$0]  (%p3239_p12), %s3084_s11, 256, %s3094_s23, %s1672_s0, %s2638_s18, %s2638_s18, %s2639_s28  }
 0x2d5   : > { %1669 = vst [vmem:[%s3096_s1] sm:$0xff] %v1667_v47  ;;  %v1668_v49 = vmax.f32 %v1666_v48, 0.0  ;;  %s3240_s2 = sshll.u32 %s2737_s19, 8  ;;  %s3241_s24 = sld [smem:[#allocation31_spill]] }
 0x2d6   : > { %s1677_s25 = scalar_lea.sflag [#allocation16], %s2965_s22  ;;  %s2542_s3 = scalar_lea.vmem %s3128_s14, 256 }
 0x2d7   : > { %1670 = vst [vmem:[%s3096_s1 + $0x8] sm:$0xff] %v1668_v49  ;;  %p2543_p0 = scmp.ne.s32.totalorder %s3128_s14, %s2542_s3  ;;  %s2640_s0 = smov [#allocation15]  }
 0x2d8   : > { %s2546_s11 = sshll.u32 %s2640_s0, 4  ;;  %s2547_s11 = int_to_ptr.vmem [resolvable:$false] %s2546_s11 }
 0x2d9   : > { %p2544_p2 = pnand %p2543_p0, %p3239_p12  ;;  %s2548_s23 = scalar_lea.vmem %s2547_s11, 512 }
 0x2da   : > { %p2549_p6 = scmp.lt.s32.totalorder %s3128_s14, %s2547_s11  ;;  %p2550_p10 = scmp.lt.s32.totalorder %s2548_s23, %s2542_s3 }
 0x2db   : > { %s3136_s26 = scalar_lea.hbm %s3241_s24, %s3240_s2  ;;  %p2545_p8 = pneg %p2544_p2 }
 0x2dc   : > { %p2551_p11 = por %p2550_p10, %p2549_p6 }
 0x2de   : > { %p2552_p3 = pnand %p2551_p11, %p2545_p8 }
 0x2e0   : > { %2555 = shalt.err (!%p2552_p3)
}
 0x2e1   : > { %s2556_s19 = scalar_lea.hbm %s3136_s26, 256  ;;  %s2560_s13 = scalar_lea.hbm %s3241_s24, 512 }
 0x2e2   : > { %p2557_p5 = scmp.ne.s32.totalorder %s3136_s26, %s2556_s19  ;;  %p2561_p4 = scmp.lt.u32.totalorder %s3136_s26, %s3241_s24 }
 0x2e3   : > { %p2562_p1 = scmp.lt.u32.totalorder %s2560_s13, %s2556_s19  ;;  %p2564_p0 = scmp.lt.u32.totalorder %s2556_s19, %s3136_s26 }
 0x2e4   : > { %p2558_p9 = pnand %p2557_p5, %p3239_p12 }
 0x2e5   : > { %p2563_p13 = por %p2562_p1, %p2561_p4 }
 0x2e6   : > { %p2559_p7 = pneg %p2558_p9 }
 0x2e7   : > { %p2565_p2 = por %p2564_p0, %p2563_p13 }
 0x2e9   : > { %p2566_p8 = pnand %p2565_p2, %p2559_p7 }
 0x2eb   : > { %2569 = shalt.err (!%p2566_p8)
}
 0x2ec   : > { %2188 = dma.vmem_to_hbm [thread:$0]  (%p3239_p12), %s3128_s14, 256, %s3136_s26, %s1677_s25, %s2638_s18, %s2638_s18, %s2639_s28  }
 0x2ed PF: > { %s1721_s3 = sand.u32 1, %s2612_s29   ;;  %p3242_p6 = scmp.ne.s32.totalorder %s3223_s17, 0 }
 0x2ee   : > { %p3243_p10 = scmp.ge.s32.totalorder %s2624_s16, 2  ;;  %s1722_s11 = scalar_lea.sflag [#allocation5], %s1721_s3 }
 0x2f0   : > { %p2212_p11 = pnand %p3243_p10, %p3242_p6 }
 0x2f2   : > { %2603 = dma.done.wait (!%p2212_p11), %s1722_s11, 256  }
 0x2f3   : > { %2605 = vsyncadd (!%p2212_p11), %s1722_s11, 4294967040  ;;  %s1731_s27 = scalar_lea.sflag [#allocation16], %s1721_s3 }
 0x2f4   : > { %2607 = dma.done.wait (!%p2212_p11), %s1731_s27, 256  }
 0x2f5   : > { %2609 = vsyncadd (!%p2212_p11), %s1731_s27, 4294967040  ;;  %p34_p12 = scmp.ge.s32.totalorder %s2889_s21, 4   ;;  %s3244_s29 = smov %s2616_s30 }
 0x2f6   : > { %s3245_s30 = smov %s2620_s15  ;;  %s3246_s15 = smov %s2901_s8 }
 0x2f7   : > { %s3247_s16 = smov %s2889_s21  ;;  %36 = sbr.rel (!%p34_p12) target bundleno = 20 (0x14), region = 157 }
 0x2fe   :  { %1736 = vsyncpa [#allocation4], 1 }
 0x2ff   :  { %1738 = vsyncpa [#allocation4 + $0x1], 1 }
 0x300   :  { %1739 = vsyncpa [#allocation7], 1 }
 0x301   :  { %1740 = vsyncpa [#allocation10], 1 }
 0x302   :  { %1741 = vsyncpa [#allocation13], 1 }
 0x303   :  { %1742 = vsyncpa [#allocation5], 1 }
 0x304   :  { %1744 = vsyncpa [#allocation5 + $0x1], 1 }
 0x305   :  { %1745 = vsyncpa [#allocation16], 1 }
 0x306   :  { %1747 = vsyncpa [#allocation16 + $0x1], 1 }

</bundles_post_ra>
